<compile_context>
chip_gen: v5e
topology: v5e:2x2
jax: 0.10.0
libtpu: 0.0.40
codegen_flags: <defaults>
</compile_context>

<pallas_src>
import math
import jax
import jax.numpy as jnp
from jax.experimental import pallas as pl
from jax.experimental.pallas import tpu as pltpu

EPSILON = 1e-4            # module's `epsilon`
LIKELIHOOD_STD_RAW = 0.5  # likelihood_std_raw init (torch.ones(1)*0.5)
LANES = 128               # TPU lane width; all slabs are 128 lanes wide


def _softplus(x):
    # matches torch.nn.Softplus (beta=1); numerically stable
    return jnp.logaddexp(x, 0.0)


def _align8(n):
    return ((n + 7) // 8) * 8


def _round_up(n, m):
    return ((n + m - 1) // m) * m


# --------------------------------------------------------------------------
# Static layout of the packed parameter slab (row offsets, all 8-aligned)
# --------------------------------------------------------------------------
def make_dims(flat_dim, num_classes, latent_dim, enc_hidden, dec_hidden, out_dim):
    h1, h2 = enc_hidden
    d1, d2 = dec_hidden
    dims = dict(F=flat_dim, C=num_classes, Z=latent_dim,
                h1=h1, h2=h2, d1=d1, d2=d2, od=out_dim)
    assert flat_dim + num_classes + latent_dim <= LANES
    assert h1 + d1 <= LANES
    assert max(h2, d2, out_dim, 2 * latent_dim) <= LANES
    assert out_dim + 3 * latent_dim <= LANES
    return dims


def make_layout(dims):
    order = [
        ("w1", LANES),            # fused first-layer weight (128, h1 + d1)
        ("eb1", 1),               # encoder layer-1 bias        (1, h1)
        ("ew2", dims["h1"]),      # encoder layer-2 weight      (h1, h2)
        ("eb2", 1),               # encoder layer-2 bias        (1, h2)
        ("lws", dims["h2"]),      # fused [mu | sigma] weight   (h2, 2Z)
        ("lbs", 1),               # fused [mu | sigma] bias     (1, 2Z)
        ("dw1z", dims["Z"]),      # decoder layer-1 z-weight    (Z, d1)
        ("db1", 1),               # decoder layer-1 bias        (1, d1)
        ("dw2", dims["d1"]),      # decoder layer-2 weight      (d1, d2)
        ("db2", 1),               # decoder layer-2 bias        (1, d2)
        ("fw", dims["d2"]),       # final_output weight         (d2, od)
        ("fb", 1),                # final_output bias           (1, od)
    ]
    layout, row = {}, 0
    for name, nrows in order:
        layout[name] = row
        row += _align8(nrows)
    return layout, _align8(row)


# --------------------------------------------------------------------------
# Fused forward kernel (one activation slab, one parameter slab, one output)
# --------------------------------------------------------------------------
def make_kernel(dims, layout):
    F, C, Z = dims["F"], dims["C"], dims["Z"]
    h1, h2, d1, d2, od = dims["h1"], dims["h2"], dims["d1"], dims["d2"], dims["od"]
    L = layout

    def kernel(act_ref, p_ref, out_ref):
        x = act_ref[...]                                   # (TB, 128): [x | onehot | eps | 0]

        # --- fused first layer: encoder L1 (cols 0:h1) + decoder label path (cols h1:h1+d1)
        w1 = p_ref[L["w1"]:L["w1"] + LANES, 0:h1 + d1]     # (128, h1+d1)
        r1 = jnp.dot(x, w1, preferred_element_type=jnp.float32)
        eb1 = p_ref[L["eb1"]:L["eb1"] + 1, 0:h1]
        h = jnp.maximum(r1[:, 0:h1] + eb1, 0.0)            # ReLU(enc layer 1)
        dec1_label = r1[:, h1:h1 + d1]                     # onehot @ dw1c

        # --- encoder layer 2 ---
        ew2 = p_ref[L["ew2"]:L["ew2"] + h1, 0:h2]
        eb2 = p_ref[L["eb2"]:L["eb2"] + 1, 0:h2]
        h = jnp.maximum(jnp.dot(h, ew2, preferred_element_type=jnp.float32) + eb2, 0.0)

        # --- fused latent heads: [mu | sigma_pre] in one matmul ---
        lws = p_ref[L["lws"]:L["lws"] + h2, 0:2 * Z]
        lbs = p_ref[L["lbs"]:L["lbs"] + 1, 0:2 * Z]
        ms = jnp.dot(h, lws, preferred_element_type=jnp.float32) + lbs
        mu = ms[:, 0:Z]
        sigma = _softplus(ms[:, Z:2 * Z]) + EPSILON

        # --- reparameterized sample (rsample): z = mu + sigma * eps ---
        eps = x[:, F + C:F + C + Z]
        z = mu + sigma * eps

        # --- decoder: layer 1 consumes cat([z, onehot]) via split weights ---
        dw1z = p_ref[L["dw1z"]:L["dw1z"] + Z, 0:d1]
        db1 = p_ref[L["db1"]:L["db1"] + 1, 0:d1]
        d = jnp.maximum(
            jnp.dot(z, dw1z, preferred_element_type=jnp.float32) + dec1_label + db1, 0.0)
        dw2 = p_ref[L["dw2"]:L["dw2"] + d1, 0:d2]
        db2 = p_ref[L["db2"]:L["db2"] + 1, 0:d2]
        d = jnp.maximum(jnp.dot(d, dw2, preferred_element_type=jnp.float32) + db2, 0.0)

        # --- final_output -> likelihood mean (reconstruction) ---
        fw = p_ref[L["fw"]:L["fw"] + d2, 0:od]
        fb = p_ref[L["fb"]:L["fb"] + 1, 0:od]
        recon = jnp.dot(d, fw, preferred_element_type=jnp.float32) + fb

        # --- lane-dense packed output: [recon | mu | sigma | z | 0-pad] ---
        out_ref[:, 0:od] = recon
        out_ref[:, od:od + Z] = mu
        out_ref[:, od + Z:od + 2 * Z] = sigma
        out_ref[:, od + 2 * Z:od + 3 * Z] = z
        tail = od + 3 * Z
        out_ref[:, tail:LANES] = jnp.zeros((x.shape[0], LANES - tail), jnp.float32)

    return kernel


# --------------------------------------------------------------------------
# Parameter construction (deterministic; xavier_normal_ for dim>1 weights)
# --------------------------------------------------------------------------
def _xavier(key, fan_in, fan_out):
    std = math.sqrt(2.0 / (fan_in + fan_out))
    return std * jax.random.normal(key, (fan_in, fan_out), dtype=jnp.float32)


def _bias(key, fan_in, fan_out):
    bound = 1.0 / math.sqrt(fan_in)
    return jax.random.uniform(key, (fan_out,), jnp.float32, -bound, bound)


def init_param_slab(key, dims, layout, total_rows):
    F, C, Z = dims["F"], dims["C"], dims["Z"]
    h1, h2, d1, d2, od = dims["h1"], dims["h2"], dims["d1"], dims["d2"], dims["od"]
    enc_in = F + C          # is_encoder_label_on=True
    dec_in = Z + C          # is_decoder_label_on=True
    keys = jax.random.split(key, 14)

    ew1 = _xavier(keys[0], enc_in, h1);  eb1 = _bias(keys[1], enc_in, h1)
    ew2 = _xavier(keys[2], h1, h2);      eb2 = _bias(keys[3], h1, h2)
    lw = _xavier(keys[4], h2, Z);        lb = _bias(keys[5], h2, Z)
    lsw = _xavier(keys[6], h2, Z);       lsb = _bias(keys[7], h2, Z)
    dw1 = _xavier(keys[8], dec_in, d1);  db1 = _bias(keys[9], dec_in, d1)
    dw2 = _xavier(keys[10], d1, d2);     db2 = _bias(keys[11], d1, d2)
    fw = _xavier(keys[12], d2, od);      fb = _bias(keys[13], d2, od)

    # fused first-layer weight (128, h1+d1):
    #   rows [0:F]     cols [0:h1]      = x-part of encoder layer 1
    #   rows [F:F+C]   cols [0:h1]      = label-part of encoder layer 1
    #   rows [F:F+C]   cols [h1:h1+d1]  = label-part of decoder layer 1
    #   all other rows (eps lanes / padding) are zero
    w1 = jnp.zeros((LANES, h1 + d1), jnp.float32)
    w1 = w1.at[0:F, 0:h1].set(ew1[:F])
    w1 = w1.at[F:F + C, 0:h1].set(ew1[F:])
    w1 = w1.at[F:F + C, h1:h1 + d1].set(dw1[Z:])

    L = layout
    slab = jnp.zeros((total_rows, LANES), jnp.float32)
    slab = slab.at[L["w1"]:L["w1"] + LANES, 0:h1 + d1].set(w1)
    slab = slab.at[L["eb1"], 0:h1].set(eb1)
    slab = slab.at[L["ew2"]:L["ew2"] + h1, 0:h2].set(ew2)
    slab = slab.at[L["eb2"], 0:h2].set(eb2)
    slab = slab.at[L["lws"]:L["lws"] + h2, 0:2 * Z].set(jnp.concatenate([lw, lsw], axis=1))
    slab = slab.at[L["lbs"], 0:2 * Z].set(jnp.concatenate([lb, lsb]))
    slab = slab.at[L["dw1z"]:L["dw1z"] + Z, 0:d1].set(dw1[:Z])
    slab = slab.at[L["db1"], 0:d1].set(db1)
    slab = slab.at[L["dw2"]:L["dw2"] + d1, 0:d2].set(dw2)
    slab = slab.at[L["db2"], 0:d2].set(db2)
    slab = slab.at[L["fw"]:L["fw"] + d2, 0:od].set(fw)
    slab = slab.at[L["fb"], 0:od].set(fb)
    return slab


# --------------------------------------------------------------------------
# Forward wrapper
# --------------------------------------------------------------------------
def make_forward(dims, layout, total_rows):
    F, C, Z, od = dims["F"], dims["C"], dims["Z"], dims["od"]
    h1, h2, d1, d2 = dims["h1"], dims["h2"], dims["d1"], dims["d2"]
    kernel = make_kernel(dims, layout)

    @jax.jit
    def forward(param_slab, inputs, labels, sample_key):
        B = inputs.shape[0]
        x_flat = inputs.reshape(B, -1).astype(jnp.float32)
        onehot = jax.nn.one_hot(labels, C, dtype=jnp.float32)
        # reparameterization noise (rsample); kept on the jax.random stream.
        # TODO(synk): could be generated in-kernel via pltpu.prng_seed /
        # stateful_normal, but that changes the RNG stream vs the reference.
        eps = jax.random.normal(sample_key, (B, Z), dtype=jnp.float32)

        # lane-dense activation slab: [x_flat | onehot | eps | 0-pad] -> (B_pad, 128)
        tb0 = _round_up(B, 8)
        TB = min(tb0, 256)                   # batch tile (multiple of 8)
        B_pad = _round_up(B, TB)
        act = jnp.concatenate([x_flat, onehot, eps], axis=1)
        act = jnp.pad(act, ((0, B_pad - B), (0, LANES - act.shape[1])))

        grid = (B_pad // TB,)
        flops = 2 * B_pad * (LANES * (h1 + d1) + h1 * h2 + h2 * 2 * Z
                             + Z * d1 + d1 * d2 + d2 * od)
        bytes_accessed = 4 * (param_slab.size + act.size + B_pad * LANES)

        out = pl.pallas_call(
            kernel,
            out_shape=jax.ShapeDtypeStruct((B_pad, LANES), jnp.float32),
            grid=grid,
            in_specs=[
                pl.BlockSpec((TB, LANES), lambda i: (i, 0)),           # activations
                pl.BlockSpec((total_rows, LANES), lambda i: (0, 0)),   # parameter slab
            ],
            out_specs=pl.BlockSpec((TB, LANES), lambda i: (i, 0)),
            compiler_params=pltpu.CompilerParams(
                dimension_semantics=("parallel",)),
            cost_estimate=pl.CostEstimate(
                flops=flops, transcendentals=B_pad * Z,
                bytes_accessed=bytes_accessed),
        )(act, param_slab)

        # split the packed output slab
        recon = out[:B, 0:od]
        mu = out[:B, od:od + Z]
        sigma = out[:B, od + Z:od + 2 * Z]
        z = out[:B, od + 2 * Z:od + 3 * Z]

        # global likelihood std: Softplus(likelihood_std_raw) + epsilon (scalar param)
        likelihood_std = _softplus(jnp.full((1,), LIKELIHOOD_STD_RAW, jnp.float32)) + EPSILON

        # VAEOutput analogue: distributions represented by their (mean, std) params.
        return {
            "observation": inputs,
            "latent_observation": z,
            "reconstruction": recon,
            "likelihood": (recon, likelihood_std),                # Normal(mean, std)
            "approximate_posterior": (mu, sigma),                 # Normal(mu, sigma)
            "prior": (jnp.zeros_like(mu), jnp.ones_like(sigma)),  # Normal(0, 1)
        }
        # TODO(synk): Dirichlet likelihood branch (use_elemental_mass=False) not
        # exercised; default config (use_elemental_mass=True) is implemented.

    return forward


# --------------------------------------------------------------------------
if __name__ == "__main__":
    key = jax.random.PRNGKey(0)
    k_param, k_input, k_label, k_sample = jax.random.split(key, 4)

    # input_shape = (1, 1, 32) -> flattened dim 32, final_output dim 32
    B, Cc, H, W = 2, 1, 1, 32
    num_classes, latent_dim = 4, 8

    dims = make_dims(flat_dim=Cc * H * W, num_classes=num_classes,
                     latent_dim=latent_dim, enc_hidden=(64, 32),
                     dec_hidden=(32, 64), out_dim=W)
    layout, total_rows = make_layout(dims)
    param_slab = init_param_slab(k_param, dims, layout, total_rows)
    forward = make_forward(dims, layout, total_rows)

    inputs = jax.random.normal(k_input, (B, Cc, H, W), dtype=jnp.float32)
    labels = jax.random.randint(k_label, (B,), 0, num_classes)

    out = forward(param_slab, inputs, labels, k_sample)
    jax.block_until_ready(out["reconstruction"])

    assert out["reconstruction"].shape == (B, W)
    assert out["latent_observation"].shape == (B, latent_dim)
    assert out["approximate_posterior"][0].shape == (B, latent_dim)
    assert bool(jnp.all(out["approximate_posterior"][1] > 0.0))
    assert bool(jnp.all(jnp.isfinite(out["reconstruction"])))
    print("KERNEL_OK")
</pallas_src>

<mosaic_0001>
module attributes {stable_mosaic.version = 11 : i64} {
  func.func @kernel(%arg0: i32, %arg1: memref<8x128xf32, #tpu.memory_space<vmem>>, %arg2: memref<376x128xf32, #tpu.memory_space<vmem>>, %arg3: memref<8x128xf32, #tpu.memory_space<vmem>>) attributes {dimension_semantics = [#tpu.dimension_semantics<parallel>], iteration_bounds = array<i64: 1>, scalar_prefetch = 0 : i64, scratch_operands = 0 : i64, tpu.core_type = #tpu.core_type<tc>, window_params = [{transform_indices = @transform_0, window_bounds = array<i64: 8, 128>}, {pipeline_mode = #tpu.pipeline_mode<synchronous>, transform_indices = @transform_1, window_bounds = array<i64: 376, 128>}, {transform_indices = @transform_2, window_bounds = array<i64: 8, 128>}]} {
    %c0 = arith.constant 0 : index
    %c0_0 = arith.constant 0 : index
    %0 = vector.load %arg1[%c0, %c0_0] : memref<8x128xf32, #tpu.memory_space<vmem>>, vector<8x128xf32>
    %c0_1 = arith.constant 0 : index
    %c0_2 = arith.constant 0 : index
    %1 = vector.load %arg2[%c0_1, %c0_2] : memref<376x128xf32, #tpu.memory_space<vmem>>, vector<128x96xf32>
    %cst = arith.constant dense<0.000000e+00> : vector<8x96xf32>
    %2 = tpu.matmul %0, %1, %cst {dimension_numbers = #tpu.dot_dimension_numbers<[1], [0], [0], [1], [0, 0, 1, 1], [], []>} : vector<8x128xf32>, vector<128x96xf32>, vector<8x96xf32> -> vector<8x96xf32>
    %c128 = arith.constant 128 : index
    %c0_3 = arith.constant 0 : index
    %3 = vector.load %arg2[%c128, %c0_3] : memref<376x128xf32, #tpu.memory_space<vmem>>, vector<1x64xf32>
    %4 = vector.extract_strided_slice %2 {offsets = [0, 0], sizes = [8, 64], strides = [1, 1]} : vector<8x96xf32> to vector<8x64xf32>
    %5 = vector.broadcast %3 : vector<1x64xf32> to vector<8x64xf32>
    %6 = arith.addf %4, %5 : vector<8x64xf32>
    %cst_4 = arith.constant 0.000000e+00 : f32
    %7 = vector.broadcast %cst_4 : f32 to vector<8x64xf32>
    %8 = arith.maximumf %6, %7 : vector<8x64xf32>
    %9 = vector.extract_strided_slice %2 {offsets = [0, 64], sizes = [8, 32], strides = [1, 1]} : vector<8x96xf32> to vector<8x32xf32>
    %c136 = arith.constant 136 : index
    %c0_5 = arith.constant 0 : index
    %10 = vector.load %arg2[%c136, %c0_5] : memref<376x128xf32, #tpu.memory_space<vmem>>, vector<64x32xf32>
    %c200 = arith.constant 200 : index
    %c0_6 = arith.constant 0 : index
    %11 = vector.load %arg2[%c200, %c0_6] : memref<376x128xf32, #tpu.memory_space<vmem>>, vector<1x32xf32>
    %cst_7 = arith.constant dense<0.000000e+00> : vector<8x32xf32>
    %12 = tpu.matmul %8, %10, %cst_7 {dimension_numbers = #tpu.dot_dimension_numbers<[1], [0], [0], [1], [0, 0, 1, 1], [], []>} : vector<8x64xf32>, vector<64x32xf32>, vector<8x32xf32> -> vector<8x32xf32>
    %13 = vector.broadcast %11 : vector<1x32xf32> to vector<8x32xf32>
    %14 = arith.addf %12, %13 : vector<8x32xf32>
    %cst_8 = arith.constant 0.000000e+00 : f32
    %15 = vector.broadcast %cst_8 : f32 to vector<8x32xf32>
    %16 = arith.maximumf %14, %15 : vector<8x32xf32>
    %c208 = arith.constant 208 : index
    %c0_9 = arith.constant 0 : index
    %17 = vector.load %arg2[%c208, %c0_9] : memref<376x128xf32, #tpu.memory_space<vmem>>, vector<32x16xf32>
    %c240 = arith.constant 240 : index
    %c0_10 = arith.constant 0 : index
    %18 = vector.load %arg2[%c240, %c0_10] : memref<376x128xf32, #tpu.memory_space<vmem>>, vector<1x16xf32>
    %cst_11 = arith.constant dense<0.000000e+00> : vector<8x16xf32>
    %19 = tpu.matmul %16, %17, %cst_11 {dimension_numbers = #tpu.dot_dimension_numbers<[1], [0], [0], [1], [0, 0, 1, 1], [], []>} : vector<8x32xf32>, vector<32x16xf32>, vector<8x16xf32> -> vector<8x16xf32>
    %20 = vector.broadcast %18 : vector<1x16xf32> to vector<8x16xf32>
    %21 = arith.addf %19, %20 : vector<8x16xf32>
    %22 = vector.extract_strided_slice %21 {offsets = [0, 0], sizes = [8, 8], strides = [1, 1]} : vector<8x16xf32> to vector<8x8xf32>
    %23 = vector.extract_strided_slice %21 {offsets = [0, 8], sizes = [8, 8], strides = [1, 1]} : vector<8x16xf32> to vector<8x8xf32>
    %cst_12 = arith.constant 0.000000e+00 : f32
    %24 = vector.broadcast %cst_12 : f32 to vector<8x8xf32>
    %25 = arith.maximumf %23, %24 : vector<8x8xf32>
    %26 = vector.broadcast %cst_12 : f32 to vector<8x8xf32>
    %27 = arith.subf %23, %26 : vector<8x8xf32>
    %28 = arith.cmpf one, %27, %27 : vector<8x8xf32>
    %29 = vector.broadcast %cst_12 : f32 to vector<8x8xf32>
    %30 = arith.addf %23, %29 : vector<8x8xf32>
    %31 = math.absf %27 : vector<8x8xf32>
    %cst_13 = arith.constant 0.000000e+00 : f32
    %32 = vector.broadcast %cst_13 : f32 to vector<8x8xf32>
    %33 = arith.subf %32, %31 : vector<8x8xf32>
    %34 = math.exp %33 : vector<8x8xf32>
    %35 = math.log1p %34 : vector<8x8xf32>
    %36 = arith.addf %25, %35 : vector<8x8xf32>
    %37 = arith.select %28, %30, %36 : vector<8x8xi1>, vector<8x8xf32>
    %cst_14 = arith.constant 9.99999974E-5 : f32
    %38 = vector.broadcast %cst_14 : f32 to vector<8x8xf32>
    %39 = arith.addf %37, %38 : vector<8x8xf32>
    %40 = vector.extract_strided_slice %0 {offsets = [0, 36], sizes = [8, 8], strides = [1, 1]} : vector<8x128xf32> to vector<8x8xf32>
    %41 = arith.mulf %39, %40 : vector<8x8xf32>
    %42 = arith.addf %22, %41 : vector<8x8xf32>
    %c248 = arith.constant 248 : index
    %c0_15 = arith.constant 0 : index
    %43 = vector.load %arg2[%c248, %c0_15] : memref<376x128xf32, #tpu.memory_space<vmem>>, vector<8x32xf32>
    %c256 = arith.constant 256 : index
    %c0_16 = arith.constant 0 : index
    %44 = vector.load %arg2[%c256, %c0_16] : memref<376x128xf32, #tpu.memory_space<vmem>>, vector<1x32xf32>
    %cst_17 = arith.constant dense<0.000000e+00> : vector<8x32xf32>
    %45 = tpu.matmul %42, %43, %cst_17 {dimension_numbers = #tpu.dot_dimension_numbers<[1], [0], [0], [1], [0, 0, 1, 1], [], []>} : vector<8x8xf32>, vector<8x32xf32>, vector<8x32xf32> -> vector<8x32xf32>
    %46 = arith.addf %45, %9 : vector<8x32xf32>
    %47 = vector.broadcast %44 : vector<1x32xf32> to vector<8x32xf32>
    %48 = arith.addf %46, %47 : vector<8x32xf32>
    %cst_18 = arith.constant 0.000000e+00 : f32
    %49 = vector.broadcast %cst_18 : f32 to vector<8x32xf32>
    %50 = arith.maximumf %48, %49 : vector<8x32xf32>
    %c264 = arith.constant 264 : index
    %c0_19 = arith.constant 0 : index
    %51 = vector.load %arg2[%c264, %c0_19] : memref<376x128xf32, #tpu.memory_space<vmem>>, vector<32x64xf32>
    %c296 = arith.constant 296 : index
    %c0_20 = arith.constant 0 : index
    %52 = vector.load %arg2[%c296, %c0_20] : memref<376x128xf32, #tpu.memory_space<vmem>>, vector<1x64xf32>
    %cst_21 = arith.constant dense<0.000000e+00> : vector<8x64xf32>
    %53 = tpu.matmul %50, %51, %cst_21 {dimension_numbers = #tpu.dot_dimension_numbers<[1], [0], [0], [1], [0, 0, 1, 1], [], []>} : vector<8x32xf32>, vector<32x64xf32>, vector<8x64xf32> -> vector<8x64xf32>
    %54 = vector.broadcast %52 : vector<1x64xf32> to vector<8x64xf32>
    %55 = arith.addf %53, %54 : vector<8x64xf32>
    %cst_22 = arith.constant 0.000000e+00 : f32
    %56 = vector.broadcast %cst_22 : f32 to vector<8x64xf32>
    %57 = arith.maximumf %55, %56 : vector<8x64xf32>
    %c304 = arith.constant 304 : index
    %c0_23 = arith.constant 0 : index
    %58 = vector.load %arg2[%c304, %c0_23] : memref<376x128xf32, #tpu.memory_space<vmem>>, vector<64x32xf32>
    %c368 = arith.constant 368 : index
    %c0_24 = arith.constant 0 : index
    %59 = vector.load %arg2[%c368, %c0_24] : memref<376x128xf32, #tpu.memory_space<vmem>>, vector<1x32xf32>
    %cst_25 = arith.constant dense<0.000000e+00> : vector<8x32xf32>
    %60 = tpu.matmul %57, %58, %cst_25 {dimension_numbers = #tpu.dot_dimension_numbers<[1], [0], [0], [1], [0, 0, 1, 1], [], []>} : vector<8x64xf32>, vector<64x32xf32>, vector<8x32xf32> -> vector<8x32xf32>
    %61 = vector.broadcast %59 : vector<1x32xf32> to vector<8x32xf32>
    %62 = arith.addf %60, %61 : vector<8x32xf32>
    %c0_26 = arith.constant 0 : index
    %c0_27 = arith.constant 0 : index
    %63 = vector.load %arg3[%c0_26, %c0_27] : memref<8x128xf32, #tpu.memory_space<vmem>>, vector<8x32xf32>
    tpu.vector_store %arg3[%c0_26, %c0_27], %62 {strides = array<i32>} : memref<8x128xf32, #tpu.memory_space<vmem>>, vector<8x32xf32>,
    %c0_28 = arith.constant 0 : index
    %c32 = arith.constant 32 : index
    %64 = vector.load %arg3[%c0_28, %c32] : memref<8x128xf32, #tpu.memory_space<vmem>>, vector<8x8xf32>
    tpu.vector_store %arg3[%c0_28, %c32], %22 {strides = array<i32>} : memref<8x128xf32, #tpu.memory_space<vmem>>, vector<8x8xf32>,
    %c0_29 = arith.constant 0 : index
    %c40 = arith.constant 40 : index
    %65 = vector.load %arg3[%c0_29, %c40] : memref<8x128xf32, #tpu.memory_space<vmem>>, vector<8x8xf32>
    tpu.vector_store %arg3[%c0_29, %c40], %39 {strides = array<i32>} : memref<8x128xf32, #tpu.memory_space<vmem>>, vector<8x8xf32>,
    %c0_30 = arith.constant 0 : index
    %c48 = arith.constant 48 : index
    %66 = vector.load %arg3[%c0_30, %c48] : memref<8x128xf32, #tpu.memory_space<vmem>>, vector<8x8xf32>
    tpu.vector_store %arg3[%c0_30, %c48], %42 {strides = array<i32>} : memref<8x128xf32, #tpu.memory_space<vmem>>, vector<8x8xf32>,
    %cst_31 = arith.constant 0.000000e+00 : f32
    %67 = vector.broadcast %cst_31 : f32 to vector<8x72xf32>
    %c0_32 = arith.constant 0 : index
    %c56 = arith.constant 56 : index
    %68 = vector.load %arg3[%c0_32, %c56] : memref<8x128xf32, #tpu.memory_space<vmem>>, vector<8x72xf32>
    tpu.vector_store %arg3[%c0_32, %c56], %67 {strides = array<i32>} : memref<8x128xf32, #tpu.memory_space<vmem>>, vector<8x72xf32>,
    return
  }
  func.func @transform_0(%arg0: i32) -> (i32, i32) {
    %c0_i32 = arith.constant 0 : i32
    %c0_i32_0 = arith.constant 0 : i32
    return %arg0, %c0_i32 : i32, i32
  }
  func.func @transform_1(%arg0: i32) -> (i32, i32) {
    %c0_i32 = arith.constant 0 : i32
    %c0_i32_0 = arith.constant 0 : i32
    %c0_i32_1 = arith.constant 0 : i32
    return %c0_i32, %c0_i32_0 : i32, i32
  }
  func.func @transform_2(%arg0: i32) -> (i32, i32) {
    %c0_i32 = arith.constant 0 : i32
    %c0_i32_0 = arith.constant 0 : i32
    return %arg0, %c0_i32 : i32, i32
  }
}

</mosaic_0001>

<bundles_post_ra>
// kernel: forward.1
= control target key start
LH: loop header
LB: loop body
LE: loop exit
PB: predicated region body
PF: predicated region fallthrough
CT: control target
= control target key end

     0   :  { %7 = vsyncpa [#allocation3], 0  ;;  %s333_s12 = smov [#allocation2]   ;;  %s334_s14 = smov 128   ;;  %s383_s0 = inlined_call_operand.vmem [shape: f32[8,128], index: 0, kind: input, shape index: {}]   ;;  %s384_s1 = inlined_call_operand.hbm [shape: f32[376,128], index: 1, kind: input, shape index: {}]   ;;  %s385_s2 = inlined_call_operand.vmem [shape: f32[8,128], index: 2, kind: output, shape index: {}]  }
   0x1   :  { %s14_s11 = sshll.u32 %s384_s1, 4  ;;  %s16_s13 = sshll.u32 %s333_s12, 4  ;;  %s15_s11 = int_to_ptr.hbm [resolvable:$true] %s14_s11  ;;  %s17_s13 = int_to_ptr.vmem [resolvable:$true] %s16_s13 }
   0x2   :  { %s335_s15 = smov 8  }
   0x3   :  { %22 = dma.hbm_to_vmem [thread:$0]  %s15_s11, 6016, %s17_s13, [#allocation3], %s334_s14, %s334_s14, %s335_s15  }
   0x4   :  { %331 = dma.done.wait [#allocation3], 6016  }
   0x5   :  { %332 = vsyncadd [#allocation3], 4294961280  ;;  %v43_v0 = vld [vmem:[#allocation2 + $0x78] sm:$0xff]  ;;  %v42_v1 = vld [vmem:[#allocation2 + $0x70] sm:$0xff]  ;;  %s336_s17 = smov 64   ;;  %vm78_vm0 = vcmask 523264  }
   0x6   :  { %44 = vmatpush.msra.mxu0 %v43_v0  ;;  %v41_v2 = vld [vmem:[#allocation2 + $0x68] sm:$0xff]  ;;  %v40_v3 = vld [vmem:[#allocation2 + $0x60] sm:$0xff]  ;;  %v39_v5 = vld [vmem:[#allocation2 + $0x58] sm:$0xff]  ;;  %s337_s18 = smov 100   ;;  %vm109_vm1 = vcmask 261120   ;;  %s339_s19 = smov 120  }
   0x7   :  { %v75_v4 = vld [vmem:[#allocation2 + $0xc0] sm:$0xff]  ;;  %v38_v6 = vld [vmem:[#allocation2 + $0x50] sm:$0xff]  ;;  %v74_v7 = vld [vmem:[#allocation2 + $0xb8] sm:$0xff]  ;;  %vm168_vm4 = vcmask 64512   ;;  %s340_s20 = smov 48   ;;  %vm263_vm5 = vcmask 326912  }
   0x8   :  { %45 = vmatpush.msra.mxu0 %v42_v1  ;;  %90 = vmatpush.msra.mxu1 %v75_v4  ;;  %v73_v8 = vld [vmem:[#allocation2 + $0xb0] sm:$0xff]  ;;  %v72_v9 = vld [vmem:[#allocation2 + $0xa8] sm:$0xff]  ;;  %v71_v11 = vld [vmem:[#allocation2 + $0xa0] sm:$0xff]  ;;  %vm269_vm6 = vcmask 392512   ;;  %vm274_vm7 = vcmask 458112   ;;  %vm276_vm8 = vcmask 1048000  }
   0x9   :  { %v37_v10 = vld [vmem:[#allocation2 + $0x48] sm:$0xff]  ;;  %v36_v12 = vld [vmem:[#allocation2 + $0x40] sm:$0xff]  ;;  %v35_v13 = vld [vmem:[#allocation2 + $0x38] sm:$0xff] }
   0xa   :  { %46 = vmatpush.msra.mxu0 %v41_v2  ;;  %91 = vmatpush.msra.mxu1 %v74_v7  ;;  %v34_v14 = vld [vmem:[#allocation2 + $0x30] sm:$0xff]  ;;  %v33_v15 = vld [vmem:[#allocation2 + $0x28] sm:$0xff]  ;;  %v32_v16 = vld [vmem:[#allocation2 + $0x20] sm:$0xff] }
   0xb   :  { %v31_v17 = vld [vmem:[#allocation2 + $0x18] sm:$0xff]  ;;  %v30_v18 = vld [vmem:[#allocation2 + $0x10] sm:$0xff]  ;;  %v29_v19 = vld [vmem:[#allocation2 + $0x8] sm:$0xff] }
   0xc   :  { %47 = vmatpush.msra.mxu0 %v40_v3  ;;  %92 = vmatpush.msra.mxu1 %v73_v8  ;;  %v28_v20 = vld [vmem:[#allocation2] sm:$0xff]  ;;  %v70_v22 = vld [vmem:[#allocation2 + $0x98] sm:$0xff]  ;;  %v69_v23 = vld [vmem:[#allocation2 + $0x90] sm:$0xff] }
   0xd   :  { %v27_v21 = vld [vmem:[%s383_s0] sm:$0xff]  ;;  %v68_v24 = vld [vmem:[#allocation2 + $0x88] sm:$0xff]  ;;  %v104_v31 = vld [vmem:[#allocation2 + $0xd8] sm:$0xff]  ;;  %s338_s0 = smov 32  }
   0xe   :  { %48 = vmatpush.msra.mxu0 %v39_v5  ;;  %93 = vmatpush.msra.mxu1 %v72_v9  ;;  %v297_v25 = vld [vmem:[#allocation2 + $0x80] ss:$0 sm:$0xff]  ;;  %v106_v29 = vld [vmem:[#allocation2 + $0xe8] sm:$0xff]  ;;  %v103_v32 = vld [vmem:[#allocation2 + $0xd0] sm:$0xff] }
   0xf   :  { %153 = vrot.lane.b32.xlu0 %v27_v21, %s337_s18  ;;  %125 = vmatpush.msra.mxu2 %v106_v29  ;;  %v105_v30 = vld [vmem:[#allocation2 + $0xe0] sm:$0xff]  ;;  %v298_v33 = vld [vmem:[#allocation2 + $0xc8] ss:$0 sm:$0xff]  ;;  %v299_v37 = vld [vmem:[#allocation2 + $0xf0] ss:$0 sm:$0xff] }
  0x10   :  { %49 = vmatpush.msra.mxu0 %v38_v6  ;;  %94 = vmatpush.msra.mxu1 %v71_v11  ;;  %v162_v58 = vld [vmem:[#allocation2 + $0xf8] sm:$0xff]  ;;  %v198_v61 = vld [vmem:[#allocation2 + $0x120] sm:$0xff]  ;;  %v196_v63 = vld [vmem:[#allocation2 + $0x110] sm:$0xff] }
  0x11   :  { %126 = vmatpush.msra.mxu2 %v105_v30  ;;  %187 = vmatpush.msra.mxu3 %v162_v58  ;;  %v197_v62 = vld [vmem:[#allocation2 + $0x118] sm:$0xff]  ;;  %v195_v0 = vld [vmem:[#allocation2 + $0x108] sm:$0xff]  ;;  %v231_v2 = vld [vmem:[#allocation2 + $0x160] sm:$0xff] }
  0x12   :  { %50 = vmatpush.msra.mxu0 %v37_v10  ;;  %95 = vmatpush.msra.mxu1 %v70_v22  ;;  %v232_v1 = vld [vmem:[#allocation2 + $0x168] sm:$0xff]  ;;  %v230_v3 = vld [vmem:[#allocation2 + $0x158] sm:$0xff]  ;;  %v229_v4 = vld [vmem:[#allocation2 + $0x150] sm:$0xff] }
  0x13   :  { %127 = vmatpush.msra.mxu2 %v104_v31  ;;  %216 = vmatpush.msrb.mxu3 %v198_v61  ;;  %v228_v5 = vld [vmem:[#allocation2 + $0x148] sm:$0xff]  ;;  %v300_v6 = vld [vmem:[#allocation2 + $0x100] ss:$0 sm:$0xff] }
  0x14   :  { %51 = vmatpush.msra.mxu0 %v36_v12  ;;  %96 = vmatpush.msra.mxu1 %v69_v23  ;;  %v227_v12 = vld [vmem:[#allocation2 + $0x140] sm:$0xff] }
  0x15   :  { %128 = vmatpush.msra.mxu2 %v103_v32  ;;  %217 = vmatpush.msrb.mxu3 %v197_v62 }
  0x16   :  { %52 = vmatpush.msra.mxu0 %v35_v13  ;;  %97 = vmatpush.msra.mxu1 %v68_v24  ;;  %v226_v13 = vld [vmem:[#allocation2 + $0x138] sm:$0xff] }
  0x17   :  { %218 = vmatpush.msrb.mxu3 %v196_v63  ;;  %246 = vmatpush.msrb.mxu2 %v232_v1 }
  0x18   :  { %53 = vmatpush.msra.mxu0 %v34_v14  ;;  %v225_v14 = vld [vmem:[#allocation2 + $0x130] sm:$0xff] }
  0x19   :  { %219 = vmatpush.msrb.mxu3 %v195_v0  ;;  %247 = vmatpush.msrb.mxu2 %v231_v2 }
  0x1a   :  { %54 = vmatpush.msra.mxu0 %v33_v15  ;;  %v301_v15 = vld [vmem:[#allocation2 + $0x128] ss:$0 sm:$0xff] }
  0x1b   :  { %248 = vmatpush.msrb.mxu2 %v230_v3 }
  0x1c   :  { %55 = vmatpush.msra.mxu0 %v32_v16 }
  0x1d   :  { %249 = vmatpush.msrb.mxu2 %v229_v4 }
  0x1e   :  { %56 = vmatpush.msra.mxu0 %v31_v17 }
  0x1f   :  { %250 = vmatpush.msrb.mxu2 %v228_v5 }
  0x20   :  { %57 = vmatpush.msra.mxu0 %v30_v18 }
  0x21   :  { %251 = vmatpush.msrb.mxu2 %v227_v12 }
  0x22   :  { %58 = vmatpush.msra.mxu0 %v29_v19 }
  0x23   :  { %252 = vmatpush.msrb.mxu2 %v226_v13 }
  0x24   :  { %59 = vmatpush.msra.mxu0 %v28_v20  ;;  %v302_v20 = vld [vmem:[#allocation2 + $0x170] ss:$0 sm:$0xff] }
  0x25   :  { %60 = vmatmul.f32.vlgmr.msra.gmra.mxu0 %v27_v21  ;;  %253 = vmatpush.msrb.mxu2 %v225_v14 }
  0x81   :  { %v154_v54 = vpop.permute.xlu0 %153 }
  0xa2   :  { %v61_v26 = vpop.f32.mrf.mxu0 }
  0xa3   :  { %v66_v27 = vadd.f32 %v297_v25, %v61_v26  ;;  %165 = vrot.lane.b32.xlu1 %v61_v26, %s336_s17  ;;  %v341_v25 = vmov 0.0  }
  0xa5   :  { %v67_v28 = vmax.f32 %v66_v27, 0.0 }
  0xa7   :  { %283 = vmatmul.msk.f32.vlgmr.msra.gmra.mxu1 %vm78_vm0, %v67_v28 }
 0x115   :  { %v166_v7 = vpop.permute.xlu1 %165 }
 0x124   :  { %v99_v34 = vpop.f32.mrf.mxu1 }
 0x125   :  { %v100_v35 = vadd.f32 %v298_v33, %v99_v34 }
 0x127   :  { %v102_v36 = vmax.f32 %v100_v35, 0.0 }
 0x129   :  { %284 = vmatmul.msk.f32.vlgmr.msra.gmra.mxu2 %vm109_vm1, %v102_v36 }
 0x1ac   :  { %v130_v38 = vpop.f32.mrf.mxu2 }
 0x1ad   :  { %v131_v39 = vadd.f32 %v299_v37, %v130_v38 }
 0x1af   :  { %v136_v40 = vand.u32 2147483647, %v131_v39  ;;  %260 = vrot.lane.b32.xlu1 %v131_v39, %s338_s0  ;;  %v133_v51 = vmax.f32 %v131_v39, 0.0  ;;  %vm134_vm3 = vcmp.ne.f32.partialorder %v131_v39, %v131_v39 }
 0x1b1   :  { %v137_v41 = vsub.f32 0.0, %v136_v40 }
 0x1b3   :  { %v138_v42 = vmul.f32 1.442695, %v137_v41 }
 0x1b5   :  { %303 = vpow2.f32 %v138_v42 }
 0x1bb   :  { %v304_v43 = vpop.eup %303 }
 0x1bc   :  { %v140_v44 = vadd.f32 1.0, %v304_v43  ;;  %v143_v45 = vmul.f32 -0.5, %v304_v43  ;;  %v146_v47 = vand.u32 2147483647, %v304_v43 }
 0x1be   :  { %305 = vlog2.f32 %v140_v44  ;;  %v144_v46 = vadd.f32 1.0, %v143_v45  ;;  %vm147_vm2 = vcmp.lt.f32.partialorder %v146_v47, 0.0004427343 }
 0x1c0   :  { %v145_v50 = vmul.f32 %v304_v43, %v144_v46 }
 0x1c4   :  { %v306_v48 = vpop.eup %305 }
 0x1c5   :  { %v142_v49 = vmul.f32 0.6931472, %v306_v48 }
 0x1c7   :  { %v148_v52 = vsel %vm147_vm2, %v145_v50, %v142_v49 }
 0x1c8   :  { %v149_v53 = vadd.f32 %v148_v52, %v133_v51 }
 0x1ca   :  { %v150_v55 = vsel %vm134_vm3, %v131_v39, %v149_v53 }
 0x1cb   :  { %v151_v56 = vadd.f32 0.0001, %v150_v55 }
 0x1cd   :  { %v156_v57 = vmul.f32 %v154_v54, %v151_v56  ;;  %266 = vrot.lane.b32.xlu2 %v151_v56, %s338_s0 }
 0x1cf   :  { %158 = vrot.lane.b32.xlu0 %v156_v57, %s339_s19 }
 0x221   :  { %v261_v23 = vpop.permute.xlu1 %260 }
 0x227   :  { %v267_v19 = vpop.permute.xlu2 %266 }
 0x241   :  { %v159_v59 = vpop.permute.xlu0 %158 }
 0x242   :  { %v161_v60 = vadd.f32 %v159_v59, %v131_v39 }
 0x244   :  { %271 = vrot.lane.b32.xlu2 %v161_v60, %s340_s20  ;;  %285 = vmatmul.msk.f32.vlgmr.msra.gmra.mxu3 %vm168_vm4, %v161_v60 }
 0x29e   :  { %v272_v24 = vpop.permute.xlu2 %271 }
 0x2c7   :  { %v189_v8 = vpop.f32.mrf.mxu3 }
 0x2c8   :  { %v190_v9 = vadd.f32 %v189_v8, %v166_v7 }
 0x2ca   :  { %v193_v10 = vadd.f32 %v300_v6, %v190_v9 }
 0x2cc   :  { %v194_v11 = vmax.f32 %v193_v10, 0.0 }
 0x2ce   :  { %286 = vmatmul.msk.f32.vlgmr.msrb.gmra.mxu3 %vm109_vm1, %v194_v11 }
 0x351   :  { %v221_v16 = vpop.f32.mrf.mxu3 }
 0x352   :  { %v222_v17 = vadd.f32 %v301_v15, %v221_v16 }
 0x354   :  { %v224_v18 = vmax.f32 %v222_v17, 0.0 }
 0x356   :  { %287 = vmatmul.msk.f32.vlgmr.msrb.gmra.mxu2 %vm78_vm0, %v224_v18 }
 0x3d9   :  { %v255_v21 = vpop.f32.mrf.mxu2 }
 0x3da   :  { %v256_v22 = vadd.f32 %v302_v20, %v255_v21 }
 0x3dc   :  { %258 = vst.msk [vmem:[%s385_s2] sm:$0xff] %vm109_vm1, %v256_v22 }
 0x3dd   :  { %264 = vst.msk [vmem:[%s385_s2] sm:$0xff] %vm263_vm5, %v261_v23 }
 0x3de   :  { %270 = vst.msk [vmem:[%s385_s2] sm:$0xff] %vm269_vm6, %v267_v19 }
 0x3df   :  { %275 = vst.msk [vmem:[%s385_s2] sm:$0xff] %vm274_vm7, %v272_v24 }
 0x3e0   :  { %277 = vst.msk [vmem:[%s385_s2] sm:$0xff] %vm276_vm8, %v341_v25 }
 0x3e1   :  { %282 = vsyncpa [#allocation3], 1 }

</bundles_post_ra>
